<compile_context>
chip_gen: v7x
topology: tpu7x:2x2x1
jax: 0.10.0
libtpu: 0.0.40
codegen_flags: <defaults>
</compile_context>

<pallas_src>
import math
import functools

import jax
import jax.numpy as jnp
from jax.experimental import pallas as pl
from jax.experimental.pallas import tpu as pltpu


def _layernorm(x, gamma, beta, eps=1e-5):
    # torch.nn.LayerNorm semantics: biased variance over last dim, eps inside sqrt.
    mu = jnp.mean(x, axis=-1, keepdims=True)
    xc = x - mu
    var = jnp.mean(xc * xc, axis=-1, keepdims=True)
    return xc * jax.lax.rsqrt(var + eps) * gamma + beta


def sab_kernel(xh_ref, wout_t_ref, params_ref, out_ref, attn_ref=None, *, norm):
    """One batch block per grid step.

    xh_ref     : (block_b, nheads, S, dh)  bf16 head-major input (Q == K == V)
    wout_t_ref : (H, H)                    bf16 out_linear weight, pre-transposed
    params_ref : (8, H)  f32 packed rows: [out_bias, g0, b0, g1, b1, pad, pad, pad]
    out_ref    : (block_b*S, H)            final output (lane-dense 2-D slab)
    attn_ref   : (block_b, nheads, S, S)   softmax attention weights (optional)
    """
    bblk, nh, S, dh = xh_ref.shape
    scale = 1.0 / math.sqrt(dh)

    # Merge the two leading (untiled) dims -> one batched MXU contraction for
    # all heads of all batch elements in this block.
    xh = xh_ref[...].reshape(bblk * nh, S, dh)                        # bf16
    xh_f32 = xh.astype(jnp.float32)

    # --- attention scores: bf16 MXU operands, f32 accumulation ---
    s = jnp.einsum('gqd,gkd->gqk', xh, xh,
                   preferred_element_type=jnp.float32) * scale        # (G,S,S) f32
    m = jnp.max(s, axis=-1, keepdims=True)
    e = jnp.exp(s - m)
    denom = jnp.sum(e, axis=-1, keepdims=True)
    inv = pl.reciprocal(denom, approx=True)                           # EUP slot
    inv = inv * (2.0 - denom * inv)                                   # 1 Newton step
    p = e * inv                                                       # (G,S,S) f32

    if attn_ref is not None:
        attn_ref[...] = p.reshape(bblk, nh, S, S)

    ctx = jnp.einsum('gqk,gkd->gqd', p.astype(jnp.bfloat16), xh,
                     preferred_element_type=jnp.float32)              # (G,S,dh) f32
    yh = xh_f32 + ctx                                                 # per-head residual

    # --- reassemble heads straight into the out_ref VMEM block (no scratch) ---
    for b in range(bblk):                                             # static unroll
        for h in range(nh):
            out_ref[b * S:(b + 1) * S, h * dh:(h + 1) * dh] = (
                yh[b * nh + h].astype(out_ref.dtype))
    y = out_ref[...].astype(jnp.float32)                              # (bblk*S, H)

    bout = params_ref[0:1, :]
    g0, b0 = params_ref[1:2, :], params_ref[2:3, :]
    g1, b1 = params_ref[3:4, :], params_ref[4:5, :]

    if norm:
        y = _layernorm(y, g0, b0)

    z = jnp.dot(y.astype(jnp.bfloat16), wout_t_ref[...],
                preferred_element_type=jnp.float32) + bout            # out_linear
    y = y + jnp.maximum(z, 0.0)                                       # x + relu(Wx + b)

    if norm:
        y = _layernorm(y, g1, b1)

    out_ref[...] = y.astype(out_ref.dtype)


def _pick_block_b(B, max_block=8, min_steps=4):
    """Largest divisor of B that is <= max_block, preferring enough grid steps
    (>= min_steps) to keep the auto-pipeliner / both v7x TensorCores busy when
    B is large; for tiny B, batch everything into one step (overhead-bound)."""
    divisors = [d for d in range(1, min(B, max_block) + 1) if B % d == 0]
    good = [d for d in divisors if B // d >= min_steps]
    return (good or divisors)[-1]


def sab_forward(query, wout, bout, g0, b0, g1, b1, *, nheads=2, norm=True,
                return_attn=True, block_b=None):
    B, S, H = query.shape
    assert H % nheads == 0
    dh = H // nheads

    if block_b is None:
        block_b = _pick_block_b(B)
    assert B % block_b == 0
    grid = (B // block_b,)

    # Head-major bf16 layout, prepared once on the XLA side (layout plumbing).
    xh = query.reshape(B, S, nheads, dh).transpose(0, 2, 1, 3).astype(jnp.bfloat16)
    wout_t = wout.T.astype(jnp.bfloat16)          # kernel does y @ W^T directly

    # Pack the 5 small parameter vectors into one sublane-aligned (8, H) block.
    params = jnp.zeros((8, H), jnp.float32)
    params = (params.at[0].set(bout).at[1].set(g0).at[2].set(b0)
                    .at[3].set(g1).at[4].set(b1))

    kernel = functools.partial(sab_kernel, norm=norm)

    in_specs = [
        pl.BlockSpec((block_b, nheads, S, dh), lambda b: (b, 0, 0, 0)),   # xh
        pl.BlockSpec((H, H), lambda b: (0, 0)),                           # W^T (constant)
        pl.BlockSpec((8, H), lambda b: (0, 0)),                           # packed params
    ]
    if return_attn:
        out_shape = (jax.ShapeDtypeStruct((B * S, H), query.dtype),
                     jax.ShapeDtypeStruct((B, nheads, S, S), jnp.float32))
        out_specs = [pl.BlockSpec((block_b * S, H), lambda b: (b, 0)),
                     pl.BlockSpec((block_b, nheads, S, S), lambda b: (b, 0, 0, 0))]
    else:
        out_shape = jax.ShapeDtypeStruct((B * S, H), query.dtype)
        out_specs = pl.BlockSpec((block_b * S, H), lambda b: (b, 0))

    # Explicit per-step VMEM arithmetic (auto-pipeliner double-buffers each block).
    bytes_per_step = (
        block_b * nheads * S * dh * 2        # xh block (bf16)
        + H * H * 2                          # W^T (bf16)
        + 8 * H * 4                          # packed params (f32)
        + block_b * S * H * 4                # out block (f32)
        + (block_b * nheads * S * S * 4 if return_attn else 0))  # attn block (f32)
    vmem_est = 5 * bytes_per_step            # 2x double-buffer + ~3x f32 intermediates
    vmem_limit = int(vmem_est) if vmem_est > (32 << 20) else None

    grid_spec = pltpu.PrefetchScalarGridSpec(
        num_scalar_prefetch=0,
        grid=grid,
        in_specs=in_specs,
        out_specs=out_specs,
    )

    result = pl.pallas_call(
        kernel,
        out_shape=out_shape,
        grid_spec=grid_spec,
        compiler_params=pltpu.CompilerParams(
            dimension_semantics=("parallel",),
            vmem_limit_bytes=vmem_limit),
    )(xh, wout_t, params)

    if return_attn:
        out2d, attn = result
        return out2d.reshape(B, S, H), attn
    return result.reshape(B, S, H)


def sab_reference(query, wout, bout, g0, b0, g1, b1, *, nheads=2, norm=True):
    """Pure-JAX f32 reference mirroring the PyTorch forward."""
    B, S, H = query.shape
    dh = H // nheads
    q = query.reshape(B, S, nheads, dh).transpose(0, 2, 1, 3)           # (B, nh, S, dh)
    scores = jnp.einsum('bhqd,bhkd->bhqk', q, q) / math.sqrt(dh)
    attn = jax.nn.softmax(scores, axis=-1)
    ctx = jnp.einsum('bhqk,bhkd->bhqd', attn, q)
    out = (q + ctx).transpose(0, 2, 1, 3).reshape(B, S, H)

    def ln(x, g, b):
        mu = x.mean(-1, keepdims=True)
        v = ((x - mu) ** 2).mean(-1, keepdims=True)
        return (x - mu) / jnp.sqrt(v + 1e-5) * g + b

    if norm:
        out = ln(out, g0, b0)
    out = out + jax.nn.relu(out @ wout.T + bout)
    if norm:
        out = ln(out, g1, b1)
    return out, attn


if __name__ == "__main__":
    B, S, H, NHEADS = 2, 8, 32, 2

    key = jax.random.PRNGKey(0)
    k_x, k_w, k_b = jax.random.split(key, 3)

    x = jax.random.normal(k_x, (B, S, H), dtype=jnp.float32)

    # out_linear params (torch default-ish uniform init), LayerNorm params (ones/zeros).
    bound = 1.0 / math.sqrt(H)
    wout = jax.random.uniform(k_w, (H, H), dtype=jnp.float32, minval=-bound, maxval=bound)
    bout = jax.random.uniform(k_b, (H,), dtype=jnp.float32, minval=-bound, maxval=bound)
    g0 = jnp.ones((H,), jnp.float32)
    b0 = jnp.zeros((H,), jnp.float32)
    g1 = jnp.ones((H,), jnp.float32)
    b1 = jnp.zeros((H,), jnp.float32)

    out, attn = sab_forward(x, wout, bout, g0, b0, g1, b1, nheads=NHEADS, norm=True)
    jax.block_until_ready(out)
    jax.block_until_ready(attn)

    out_ref, attn_ref = sab_reference(x, wout, bout, g0, b0, g1, b1,
                                      nheads=NHEADS, norm=True)
    assert out.shape == (B, S, H) and attn.shape == (B, NHEADS, S, S)
    # Tolerances reflect bf16 MXU operands (f32 accumulation) vs. the pure-f32
    # reference: scores/ctx/out_linear pick up ~1e-3..1e-2 mixed-precision error.
    # The softmax division itself is exact (Newton-refined reciprocal).
    assert jnp.allclose(attn, attn_ref, atol=1e-2, rtol=1e-2), "attn mismatch"
    assert jnp.allclose(out, out_ref, atol=2e-2, rtol=2e-2), "output mismatch"

    print("KERNEL_OK")
</pallas_src>

<mosaic_0001>
module attributes {stable_mosaic.version = 11 : i64} {
  func.func @sab_kernel(%arg0: i32, %arg1: memref<2x2x8x16xbf16, #tpu.memory_space<vmem>>, %arg2: memref<32x32xbf16, #tpu.memory_space<vmem>>, %arg3: memref<8x32xf32, #tpu.memory_space<vmem>>, %arg4: memref<16x32xf32, #tpu.memory_space<vmem>>, %arg5: memref<2x2x8x8xf32, #tpu.memory_space<vmem>>) attributes {dimension_semantics = [#tpu.dimension_semantics<parallel>], iteration_bounds = array<i64: 1>, scalar_prefetch = 0 : i64, scratch_operands = 0 : i64, tpu.core_type = #tpu.core_type<tc>, window_params = [{transform_indices = @transform_0, window_bounds = array<i64: 2, 2, 8, 16>}, {pipeline_mode = #tpu.pipeline_mode<synchronous>, transform_indices = @transform_1, window_bounds = array<i64: 32, 32>}, {pipeline_mode = #tpu.pipeline_mode<synchronous>, transform_indices = @transform_2, window_bounds = array<i64: 8, 32>}, {transform_indices = @transform_3, window_bounds = array<i64: 16, 32>}, {transform_indices = @transform_4, window_bounds = array<i64: 2, 2, 8, 8>}]} {
    %c0 = arith.constant 0 : index
    %c0_0 = arith.constant 0 : index
    %c0_1 = arith.constant 0 : index
    %c0_2 = arith.constant 0 : index
    %0 = vector.load %arg1[%c0, %c0_0, %c0_1, %c0_2] : memref<2x2x8x16xbf16, #tpu.memory_space<vmem>>, vector<2x2x8x16xbf16>
    %1 = vector.shape_cast %0 : vector<2x2x8x16xbf16> to vector<4x8x16xbf16>
    %2 = arith.extf %1 : vector<4x8x16xbf16> to vector<4x8x16xf32>
    "tpu.trace_start"() <{level = 10 : i32, message = "gqd,gkd->gqk"}> : () -> ()
    %cst = arith.constant dense<0.000000e+00> : vector<4x8x8xf32>
    %3 = tpu.matmul %1, %1, %cst {dimension_numbers = #tpu.dot_dimension_numbers<[2], [2], [1], [1], [0, 0, 0, 1, 1, 1], [0], [0]>} : vector<4x8x16xbf16>, vector<4x8x16xbf16>, vector<4x8x8xf32> -> vector<4x8x8xf32>
    "tpu.trace_stop"() : () -> ()
    %cst_3 = arith.constant 2.500000e-01 : f32
    %4 = vector.broadcast %cst_3 : f32 to vector<4x8x8xf32>
    %5 = arith.mulf %3, %4 : vector<4x8x8xf32>
    %cst_4 = arith.constant dense<0xFF800000> : vector<4x8xf32>
    %6 = vector.multi_reduction <maximumf>, %5, %cst_4 [2] : vector<4x8x8xf32> to vector<4x8xf32>
    %7 = vector.shape_cast %6 : vector<4x8xf32> to vector<4x8x1xf32>
    %8 = vector.broadcast %7 : vector<4x8x1xf32> to vector<4x8x8xf32>
    %9 = arith.subf %5, %8 : vector<4x8x8xf32>
    %10 = math.exp %9 : vector<4x8x8xf32>
    %cst_5 = arith.constant dense<0.000000e+00> : vector<4x8xf32>
    %11 = vector.multi_reduction <add>, %10, %cst_5 [2] : vector<4x8x8xf32> to vector<4x8xf32>
    %12 = vector.shape_cast %11 : vector<4x8xf32> to vector<4x8x1xf32>
    %13 = tpu.reciprocal %12 {approx = true} : vector<4x8x1xf32> -> vector<4x8x1xf32>
    %14 = arith.mulf %12, %13 : vector<4x8x1xf32>
    %cst_6 = arith.constant 2.000000e+00 : f32
    %15 = vector.broadcast %cst_6 : f32 to vector<4x8x1xf32>
    %16 = arith.subf %15, %14 : vector<4x8x1xf32>
    %17 = arith.mulf %13, %16 : vector<4x8x1xf32>
    %18 = vector.broadcast %17 : vector<4x8x1xf32> to vector<4x8x8xf32>
    %19 = arith.mulf %10, %18 : vector<4x8x8xf32>
    %20 = vector.shape_cast %19 : vector<4x8x8xf32> to vector<2x2x8x8xf32>
    %c0_7 = arith.constant 0 : index
    %c0_8 = arith.constant 0 : index
    %c0_9 = arith.constant 0 : index
    %c0_10 = arith.constant 0 : index
    %21 = vector.load %arg5[%c0_7, %c0_8, %c0_9, %c0_10] : memref<2x2x8x8xf32, #tpu.memory_space<vmem>>, vector<2x2x8x8xf32>
    tpu.vector_store %arg5[%c0_7, %c0_8, %c0_9, %c0_10], %20 {strides = array<i32>} : memref<2x2x8x8xf32, #tpu.memory_space<vmem>>, vector<2x2x8x8xf32>,
    %22 = arith.truncf %19 : vector<4x8x8xf32> to vector<4x8x8xbf16>
    "tpu.trace_start"() <{level = 10 : i32, message = "gqk,gkd->gqd"}> : () -> ()
    %cst_11 = arith.constant dense<0.000000e+00> : vector<4x8x16xf32>
    %23 = tpu.matmul %22, %1, %cst_11 {dimension_numbers = #tpu.dot_dimension_numbers<[2], [1], [1], [2], [0, 0, 0, 1, 1, 2], [0], [0]>} : vector<4x8x8xbf16>, vector<4x8x16xbf16>, vector<4x8x16xf32> -> vector<4x8x16xf32>
    "tpu.trace_stop"() : () -> ()
    %24 = arith.addf %2, %23 : vector<4x8x16xf32>
    %25 = vector.extract_strided_slice %24 {offsets = [0, 0, 0], sizes = [1, 8, 16], strides = [1, 1, 1]} : vector<4x8x16xf32> to vector<1x8x16xf32>
    %26 = vector.shape_cast %25 : vector<1x8x16xf32> to vector<8x16xf32>
    %c0_12 = arith.constant 0 : index
    %c0_13 = arith.constant 0 : index
    %27 = vector.load %arg4[%c0_12, %c0_13] : memref<16x32xf32, #tpu.memory_space<vmem>>, vector<8x16xf32>
    tpu.vector_store %arg4[%c0_12, %c0_13], %26 {strides = array<i32>} : memref<16x32xf32, #tpu.memory_space<vmem>>, vector<8x16xf32>,
    %28 = vector.extract_strided_slice %24 {offsets = [1, 0, 0], sizes = [1, 8, 16], strides = [1, 1, 1]} : vector<4x8x16xf32> to vector<1x8x16xf32>
    %29 = vector.shape_cast %28 : vector<1x8x16xf32> to vector<8x16xf32>
    %c0_14 = arith.constant 0 : index
    %c16 = arith.constant 16 : index
    %30 = vector.load %arg4[%c0_14, %c16] : memref<16x32xf32, #tpu.memory_space<vmem>>, vector<8x16xf32>
    tpu.vector_store %arg4[%c0_14, %c16], %29 {strides = array<i32>} : memref<16x32xf32, #tpu.memory_space<vmem>>, vector<8x16xf32>,
    %31 = vector.extract_strided_slice %24 {offsets = [2, 0, 0], sizes = [1, 8, 16], strides = [1, 1, 1]} : vector<4x8x16xf32> to vector<1x8x16xf32>
    %32 = vector.shape_cast %31 : vector<1x8x16xf32> to vector<8x16xf32>
    %c8 = arith.constant 8 : index
    %c0_15 = arith.constant 0 : index
    %33 = vector.load %arg4[%c8, %c0_15] : memref<16x32xf32, #tpu.memory_space<vmem>>, vector<8x16xf32>
    tpu.vector_store %arg4[%c8, %c0_15], %32 {strides = array<i32>} : memref<16x32xf32, #tpu.memory_space<vmem>>, vector<8x16xf32>,
    %34 = vector.extract_strided_slice %24 {offsets = [3, 0, 0], sizes = [1, 8, 16], strides = [1, 1, 1]} : vector<4x8x16xf32> to vector<1x8x16xf32>
    %35 = vector.shape_cast %34 : vector<1x8x16xf32> to vector<8x16xf32>
    %c8_16 = arith.constant 8 : index
    %c16_17 = arith.constant 16 : index
    %36 = vector.load %arg4[%c8_16, %c16_17] : memref<16x32xf32, #tpu.memory_space<vmem>>, vector<8x16xf32>
    tpu.vector_store %arg4[%c8_16, %c16_17], %35 {strides = array<i32>} : memref<16x32xf32, #tpu.memory_space<vmem>>, vector<8x16xf32>,
    %c0_18 = arith.constant 0 : index
    %c0_19 = arith.constant 0 : index
    %37 = vector.load %arg4[%c0_18, %c0_19] : memref<16x32xf32, #tpu.memory_space<vmem>>, vector<16x32xf32>
    %c0_20 = arith.constant 0 : index
    %c0_21 = arith.constant 0 : index
    %38 = vector.load %arg3[%c0_20, %c0_21] : memref<8x32xf32, #tpu.memory_space<vmem>>, vector<1x32xf32>
    %c1 = arith.constant 1 : index
    %c0_22 = arith.constant 0 : index
    %39 = vector.load %arg3[%c1, %c0_22] : memref<8x32xf32, #tpu.memory_space<vmem>>, vector<1x32xf32>
    %c2 = arith.constant 2 : index
    %c0_23 = arith.constant 0 : index
    %40 = vector.load %arg3[%c2, %c0_23] : memref<8x32xf32, #tpu.memory_space<vmem>>, vector<1x32xf32>
    %c3 = arith.constant 3 : index
    %c0_24 = arith.constant 0 : index
    %41 = vector.load %arg3[%c3, %c0_24] : memref<8x32xf32, #tpu.memory_space<vmem>>, vector<1x32xf32>
    %c4 = arith.constant 4 : index
    %c0_25 = arith.constant 0 : index
    %42 = vector.load %arg3[%c4, %c0_25] : memref<8x32xf32, #tpu.memory_space<vmem>>, vector<1x32xf32>
    %cst_26 = arith.constant dense<0.000000e+00> : vector<16xf32>
    %43 = vector.multi_reduction <add>, %37, %cst_26 [1] : vector<16x32xf32> to vector<16xf32>
    %44 = vector.shape_cast %43 : vector<16xf32> to vector<16x1xf32>
    %cst_27 = arith.constant 3.200000e+01 : f32
    %45 = vector.broadcast %cst_27 : f32 to vector<16x1xf32>
    %46 = arith.divf %44, %45 : vector<16x1xf32>
    %47 = vector.broadcast %46 : vector<16x1xf32> to vector<16x32xf32>
    %48 = arith.subf %37, %47 : vector<16x32xf32>
    %49 = arith.mulf %48, %48 : vector<16x32xf32>
    %cst_28 = arith.constant dense<0.000000e+00> : vector<16xf32>
    %50 = vector.multi_reduction <add>, %49, %cst_28 [1] : vector<16x32xf32> to vector<16xf32>
    %51 = vector.shape_cast %50 : vector<16xf32> to vector<16x1xf32>
    %cst_29 = arith.constant 3.200000e+01 : f32
    %52 = vector.broadcast %cst_29 : f32 to vector<16x1xf32>
    %53 = arith.divf %51, %52 : vector<16x1xf32>
    %cst_30 = arith.constant 9.99999974E-6 : f32
    %54 = vector.broadcast %cst_30 : f32 to vector<16x1xf32>
    %55 = arith.addf %53, %54 : vector<16x1xf32>
    %56 = math.rsqrt %55 : vector<16x1xf32>
    %57 = vector.broadcast %56 : vector<16x1xf32> to vector<16x32xf32>
    %58 = arith.mulf %48, %57 : vector<16x32xf32>
    %59 = vector.broadcast %39 : vector<1x32xf32> to vector<16x32xf32>
    %60 = arith.mulf %58, %59 : vector<16x32xf32>
    %61 = vector.broadcast %40 : vector<1x32xf32> to vector<16x32xf32>
    %62 = arith.addf %60, %61 : vector<16x32xf32>
    %63 = arith.truncf %62 : vector<16x32xf32> to vector<16x32xbf16>
    %c0_31 = arith.constant 0 : index
    %c0_32 = arith.constant 0 : index
    %64 = vector.load %arg2[%c0_31, %c0_32] : memref<32x32xbf16, #tpu.memory_space<vmem>>, vector<32x32xbf16>
    %cst_33 = arith.constant dense<0.000000e+00> : vector<16x32xf32>
    %65 = tpu.matmul %63, %64, %cst_33 {dimension_numbers = #tpu.dot_dimension_numbers<[1], [0], [0], [1], [0, 0, 1, 1], [], []>} : vector<16x32xbf16>, vector<32x32xbf16>, vector<16x32xf32> -> vector<16x32xf32>
    %66 = vector.broadcast %38 : vector<1x32xf32> to vector<16x32xf32>
    %67 = arith.addf %65, %66 : vector<16x32xf32>
    %cst_34 = arith.constant 0.000000e+00 : f32
    %68 = vector.broadcast %cst_34 : f32 to vector<16x32xf32>
    %69 = arith.maximumf %67, %68 : vector<16x32xf32>
    %70 = arith.addf %62, %69 : vector<16x32xf32>
    %cst_35 = arith.constant dense<0.000000e+00> : vector<16xf32>
    %71 = vector.multi_reduction <add>, %70, %cst_35 [1] : vector<16x32xf32> to vector<16xf32>
    %72 = vector.shape_cast %71 : vector<16xf32> to vector<16x1xf32>
    %cst_36 = arith.constant 3.200000e+01 : f32
    %73 = vector.broadcast %cst_36 : f32 to vector<16x1xf32>
    %74 = arith.divf %72, %73 : vector<16x1xf32>
    %75 = vector.broadcast %74 : vector<16x1xf32> to vector<16x32xf32>
    %76 = arith.subf %70, %75 : vector<16x32xf32>
    %77 = arith.mulf %76, %76 : vector<16x32xf32>
    %cst_37 = arith.constant dense<0.000000e+00> : vector<16xf32>
    %78 = vector.multi_reduction <add>, %77, %cst_37 [1] : vector<16x32xf32> to vector<16xf32>
    %79 = vector.shape_cast %78 : vector<16xf32> to vector<16x1xf32>
    %cst_38 = arith.constant 3.200000e+01 : f32
    %80 = vector.broadcast %cst_38 : f32 to vector<16x1xf32>
    %81 = arith.divf %79, %80 : vector<16x1xf32>
    %cst_39 = arith.constant 9.99999974E-6 : f32
    %82 = vector.broadcast %cst_39 : f32 to vector<16x1xf32>
    %83 = arith.addf %81, %82 : vector<16x1xf32>
    %84 = math.rsqrt %83 : vector<16x1xf32>
    %85 = vector.broadcast %84 : vector<16x1xf32> to vector<16x32xf32>
    %86 = arith.mulf %76, %85 : vector<16x32xf32>
    %87 = vector.broadcast %41 : vector<1x32xf32> to vector<16x32xf32>
    %88 = arith.mulf %86, %87 : vector<16x32xf32>
    %89 = vector.broadcast %42 : vector<1x32xf32> to vector<16x32xf32>
    %90 = arith.addf %88, %89 : vector<16x32xf32>
    %c0_40 = arith.constant 0 : index
    %c0_41 = arith.constant 0 : index
    %91 = vector.load %arg4[%c0_40, %c0_41] : memref<16x32xf32, #tpu.memory_space<vmem>>, vector<16x32xf32>
    tpu.vector_store %arg4[%c0_40, %c0_41], %90 {strides = array<i32>} : memref<16x32xf32, #tpu.memory_space<vmem>>, vector<16x32xf32>,
    return
  }
  func.func @transform_0(%arg0: i32) -> (i32, i32, i32, i32) {
    %c0_i32 = arith.constant 0 : i32
    %c0_i32_0 = arith.constant 0 : i32
    %c0_i32_1 = arith.constant 0 : i32
    %c0_i32_2 = arith.constant 0 : i32
    return %arg0, %c0_i32, %c0_i32_0, %c0_i32_1 : i32, i32, i32, i32
  }
  func.func @transform_1(%arg0: i32) -> (i32, i32) {
    %c0_i32 = arith.constant 0 : i32
    %c0_i32_0 = arith.constant 0 : i32
    %c0_i32_1 = arith.constant 0 : i32
    return %c0_i32, %c0_i32_0 : i32, i32
  }
  func.func @transform_2(%arg0: i32) -> (i32, i32) {
    %c0_i32 = arith.constant 0 : i32
    %c0_i32_0 = arith.constant 0 : i32
    %c0_i32_1 = arith.constant 0 : i32
    return %c0_i32, %c0_i32_0 : i32, i32
  }
  func.func @transform_3(%arg0: i32) -> (i32, i32) {
    %c0_i32 = arith.constant 0 : i32
    %c0_i32_0 = arith.constant 0 : i32
    return %arg0, %c0_i32 : i32, i32
  }
  func.func @transform_4(%arg0: i32) -> (i32, i32, i32, i32) {
    %c0_i32 = arith.constant 0 : i32
    %c0_i32_0 = arith.constant 0 : i32
    %c0_i32_1 = arith.constant 0 : i32
    %c0_i32_2 = arith.constant 0 : i32
    return %arg0, %c0_i32, %c0_i32_0, %c0_i32_1 : i32, i32, i32, i32
  }
}

</mosaic_0001>

<bundles_post_ra>
// kernel: tpu_custom_call.1
= control target key start
LH: loop header
LB: loop body
LE: loop exit
PB: predicated region body
PF: predicated region fallthrough
CT: control target
= control target key end

     0   :  { %10 = vsyncpa [#allocation3], 0  ;;  %s1146_s0 = inlined_call_operand.hbm [shape: bf16[2,2,8,16], index: 0, kind: input, shape index: {}]   ;;  %s1147_s1 = inlined_call_operand.hbm [shape: bf16[32,32], index: 1, kind: input, shape index: {}]   ;;  %s1148_s2 = inlined_call_operand.hbm [shape: f32[8,32], index: 2, kind: input, shape index: {}]   ;;  %s1149_s3 = inlined_call_operand.hbm [shape: f32[16,32], index: 3, kind: output, shape index: {0}]   ;;  %s1150_s4 = inlined_call_operand.hbm [shape: f32[2,2,8,8], index: 4, kind: output, shape index: {1}]  }
   0x1   :  { %11 = vsyncpa [#allocation6], 0 }
   0x2   :  { %12 = vsyncpa [#allocation4], 0 }
   0x3   :  { %13 = vsyncpa [#allocation10], 0  ;;  %s943_s15 = smov [#allocation5]   ;;  %s944_s17 = smov [#allocation2]  }
   0x4   :  { %s31_s16 = sshll.u32 %s943_s15, 4  ;;  %s19_s18 = sshll.u32 %s944_s17, 4  ;;  %s32_s16 = int_to_ptr.vmem [resolvable:$true] %s31_s16  ;;  %s980_s18 = int_to_ptr.vmem [resolvable:$true] %s19_s18 }
   0x5   :  { %s825_s21 = scalar_lea.hbm %s1147_s1, 256 }
   0x6   :  { %p826_p0 = scmp.ne.s32.totalorder %s1147_s1, %s825_s21  ;;  %p829_p1 = scmp.lt.u32.totalorder %s825_s21, %s1147_s1 }
   0x8   :  { %p831_p2 = pnand %p829_p1, %p826_p0 }
   0xa   :  { %834 = shalt.err (!%p831_p2)
}
   0xb   :  { %s835_s26 = scalar_lea.vmem %s32_s16, 256  ;;  %p840_p4 = scmp.lt.s32.totalorder %s32_s16, %s32_s16 }
   0xc   :  { %p836_p3 = scmp.ne.s32.totalorder %s32_s16, %s835_s26  ;;  %p841_p5 = scmp.lt.s32.totalorder %s835_s26, %s835_s26 }
   0xe   :  { %p842_p6 = por %p841_p5, %p840_p4 }
  0x10   :  { %p843_p7 = pnand %p842_p6, %p836_p3 }
  0x12   :  { %846 = shalt.err (!%p843_p7)
}
  0x13   :  { %s945_s27 = smov 64   ;;  %s946_s28 = smov 4  }
  0x14   :  { %37 = dma.hbm_to_vmem [thread:$0]  %s1147_s1, 256, %s32_s16, [#allocation6], %s945_s27, %s945_s27, %s946_s28  }
  0x15   :  { %s847_s7 = scalar_lea.hbm %s1146_s0, 256 }
  0x16   :  { %p848_p8 = scmp.ne.s32.totalorder %s1146_s0, %s847_s7  ;;  %p851_p9 = scmp.lt.u32.totalorder %s847_s7, %s1146_s0 }
  0x18   :  { %p853_p10 = pnand %p851_p9, %p848_p8 }
  0x1a   :  { %856 = shalt.err (!%p853_p10)
}
  0x1b   :  { %s857_s12 = scalar_lea.vmem %s980_s18, 256  ;;  %p862_p12 = scmp.lt.s32.totalorder %s980_s18, %s980_s18 }
  0x1c   :  { %p858_p11 = scmp.ne.s32.totalorder %s980_s18, %s857_s12  ;;  %p863_p13 = scmp.lt.s32.totalorder %s857_s12, %s857_s12 }
  0x1e   :  { %p864_p0 = por %p863_p13, %p862_p12 }
  0x20   :  { %p865_p1 = pnand %p864_p0, %p858_p11 }
  0x22   :  { %868 = shalt.err (!%p865_p1)
}
  0x23   :  { %25 = dma.hbm_to_vmem [thread:$0]  %s1146_s0, 256, %s980_s18, [#allocation3], %s945_s27, %s945_s27, %s946_s28  }
  0x24   :  { %s947_s14 = smov [#allocation7]   ;;  %s869_s19 = scalar_lea.hbm %s1148_s2, 128 }
  0x25   :  { %s44_s15 = sshll.u32 %s947_s14, 4  ;;  %p870_p2 = scmp.ne.s32.totalorder %s1148_s2, %s869_s19  ;;  %s45_s15 = int_to_ptr.vmem [resolvable:$true] %s44_s15 }
  0x26   :  { %p873_p3 = scmp.lt.u32.totalorder %s869_s19, %s1148_s2 }
  0x28   :  { %p875_p4 = pnand %p873_p3, %p870_p2 }
  0x2a   :  { %878 = shalt.err (!%p875_p4)
}
  0x2b   :  { %s879_s24 = scalar_lea.vmem %s45_s15, 128  ;;  %p884_p6 = scmp.lt.s32.totalorder %s45_s15, %s45_s15 }
  0x2c   :  { %p880_p5 = scmp.ne.s32.totalorder %s45_s15, %s879_s24  ;;  %p885_p7 = scmp.lt.s32.totalorder %s879_s24, %s879_s24 }
  0x2e   :  { %p886_p8 = por %p885_p7, %p884_p6 }
  0x30   :  { %p887_p9 = pnand %p886_p8, %p880_p5 }
  0x32   :  { %890 = shalt.err (!%p887_p9)
}
  0x33   :  { %47 = dma.hbm_to_vmem [thread:$0]  %s1148_s2, 128, %s45_s15, [#allocation6]  }
  0x34   :  { %935 = dma.done.wait [#allocation3], 256  }
  0x35   :  { %936 = vsyncadd [#allocation3], 4294967040 }
  0x36   :  { %937 = dma.done.wait [#allocation6], 384  }
  0x37   :  { %938 = vsyncadd [#allocation6], 4294966912  ;;  %v948_v0 = vmov 0.0   ;;  %vm949_vm0 = vmmov 0   ;;  %vm66_vm1 = vcmask 130048   ;;  %vm243_vm2 = vcmask 64512  }
  0x38   :  { %731 = vmatprep.subr.bf16.mxu0 %v948_v0  ;;  %737 = vmatprep.subr.bf16.mxu1 %v948_v0  ;;  %v1029_v1 = vld [vmem:[#allocation2] sm:$0xf]  ;;  %v1031_v2 = vld [vmem:[#allocation2 + $0x4] sm:$0xf]  ;;  %v1039_v5 = vld [vmem:[#allocation2 + $0x8] sm:$0xf] }
  0x39   :  { %733 = vmatprep.mubr.msk.bf16.mxu0 %vm949_vm0, %v948_v0  ;;  %739 = vmatprep.mubr.msk.bf16.mxu1 %vm949_vm0, %v948_v0  ;;  %v68_v3 = vsel %vm66_vm1, %v1029_v1, 0  ;;  %v111_v4 = vsel %vm66_vm1, %v1031_v2, 0  ;;  %v1041_v6 = vld [vmem:[#allocation2 + $0xc] sm:$0xf]  ;;  %v154_v7 = vsel %vm66_vm1, %v1039_v5, 0  ;;  %vm311_vm3 = vcmask 1043456  }
  0x3a   :  { %732 = vmatpush3.bf16.xpose.msra.mxu0 %v68_v3  ;;  %738 = vmatpush3.bf16.xpose.msra.mxu1 %v111_v4  ;;  %v197_v8 = vsel %vm66_vm1, %v1041_v6, 0  ;;  %v357_v53 = vsel %vm311_vm3, %v1031_v2, 0  ;;  %v312_v54 = vsel %vm311_vm3, %v1029_v1, 0  ;;  %s950_s2 = smov 16   ;;  %vm498_vm4 = vcmask 261248   ;;  %s951_s25 = smov [#allocation9]  }
  0x3b   :  { %743 = vmatprep.subr.bf16.mxu0 %v948_v0  ;;  %749 = vmatprep.subr.bf16.mxu1 %v948_v0  ;;  %vm513_vm5 = vcmask 261120   ;;  %s679_s26 = sshll.u32 %s951_s25, 4  ;;  %s680_s26 = int_to_ptr.vmem [resolvable:$true] %s679_s26 }
  0x3c   :  { %s891_s27 = scalar_lea.vmem %s680_s26, 512  ;;  %p896_p11 = scmp.lt.s32.totalorder %s680_s26, %s680_s26 }
  0x3d   :  { %p892_p10 = scmp.ne.s32.totalorder %s680_s26, %s891_s27  ;;  %p897_p12 = scmp.lt.s32.totalorder %s891_s27, %s891_s27 }
  0x3f   :  { %p898_p13 = por %p897_p12, %p896_p11 }
  0x41   :  { %734 = vmatmul.mubr.msk.bf16.vlgmr.msra.gmra.mrb[0].mxu0 %vm66_vm1, %v1029_v1  ;;  %740 = vmatmul.mubr.msk.bf16.vlgmr.msra.gmra.mrb[0].mxu1 %vm66_vm1, %v1031_v2  ;;  %p899_p0 = pnand %p898_p13, %p892_p10 }
  0x42   :  { %744 = vmatpush3.bf16.xpose.msra.mxu0 %v154_v7  ;;  %750 = vmatpush3.bf16.xpose.msra.mxu1 %v197_v8 }
  0x43   :  { %745 = vmatprep.mubr.msk.bf16.mxu0 %vm949_vm0, %v948_v0  ;;  %751 = vmatprep.mubr.msk.bf16.mxu1 %vm949_vm0, %v948_v0 }
  0x44   :  { %761 = vmatprep.subr.bf16.mxu1 %v948_v0  ;;  %755 = vmatprep.subr.bf16.mxu0 %v948_v0 }
  0x49   :  { %746 = vmatmul.mubr.msk.bf16.vlgmr.msra.gmra.mrb[4].mxu0 %vm66_vm1, %v1039_v5  ;;  %752 = vmatmul.mubr.msk.bf16.vlgmr.msra.gmra.mrb[4].mxu1 %vm66_vm1, %v1041_v6 }
  0x4a   :  { %763 = vmatprep.mubr.msk.bf16.mxu1 %vm949_vm0, %v948_v0  ;;  %757 = vmatprep.mubr.msk.bf16.mxu0 %vm949_vm0, %v948_v0 }
  0x4b   :  { %762 = vmatpush3.bf16.msra.mxu1 %v357_v53  ;;  %756 = vmatpush3.bf16.msra.mxu0 %v312_v54 }
  0x4c   :  { %773 = vmatprep.subr.bf16.mxu1 %v948_v0  ;;  %767 = vmatprep.subr.bf16.mxu0 %v948_v0 }
 0x114   :  { %v104_v9 = vpop.f32.mrb[0].mxu0  ;;  %v147_v10 = vpop.f32.mrb[0].mxu1 }
 0x115   :  { %v239_v11 = vmul.f32 0.25, %v104_v9  ;;  %v240_v12 = vmul.f32 0.25, %v147_v10  ;;  %v741_v13 = vpop.f32.mrb[1].mxu1  ;;  %v735_v14 = vpop.f32.mrb[1].mxu0 }
 0x116   :  { %v150_v15 = vpop.f32.mrb[2].mxu1  ;;  %v107_v16 = vpop.f32.mrb[2].mxu0 }
 0x117   :  { %v742_v17 = vpop.f32.mrb[3].mxu1  ;;  %v247_v18 = vsel %vm243_vm2, %v240_v12, -inf  ;;  %v244_v19 = vsel %vm243_vm2, %v239_v11, -inf  ;;  %v736_v20 = vpop.f32.mrb[3].mxu0 }
 0x118   :  { %248 = vmax.xlane.f32.xlu0 %v247_v18  ;;  %245 = vmax.xlane.f32.xlu1 %v244_v19  ;;  %v402_v19 = vsel %vm311_vm3, %v1039_v5, 0 }
 0x11c   :  { %v190_v21 = vpop.f32.mrb[4].mxu0  ;;  %v233_v22 = vpop.f32.mrb[4].mxu1 }
 0x11d   :  { %v241_v23 = vmul.f32 0.25, %v190_v21  ;;  %v242_v24 = vmul.f32 0.25, %v233_v22  ;;  %v753_v25 = vpop.f32.mrb[5].mxu1  ;;  %v747_v26 = vpop.f32.mrb[5].mxu0 }
 0x11e   :  { %v236_v27 = vpop.f32.mrb[6].mxu1  ;;  %v193_v28 = vpop.f32.mrb[6].mxu0  ;;  %v63_v26 = vunpack.c.l.bf16 %v1031_v2 }
 0x11f   :  { %v754_v29 = vpop.f32.mrb[7].mxu1  ;;  %v253_v30 = vsel %vm243_vm2, %v242_v24, -inf  ;;  %v250_v31 = vsel %vm243_vm2, %v241_v23, -inf  ;;  %v748_v32 = vpop.f32.mrb[7].mxu0 }
 0x120   :  { %254 = vmax.xlane.f32.xlu0 %v253_v30  ;;  %251 = vmax.xlane.f32.xlu1 %v250_v31  ;;  %v62_v30 = vunpack.c.l.bf16 %v1029_v1 }
 0x1a5   :  { %v249_v33 = vpop.xlane.xlu0 %248  ;;  %v246_v34 = vpop.xlane.xlu1 %245 }
 0x1a6   :  { %v257_v35 = vsub.f32 %v240_v12, %v249_v33  ;;  %v256_v36 = vsub.f32 %v239_v11, %v246_v34  ;;  %v447_v12 = vsel %vm311_vm3, %v1041_v6, 0 }
 0x1a8   :  { %v262_v37 = vmul.f32 1.442695, %v257_v35  ;;  %v260_v38 = vmul.f32 1.442695, %v256_v36  ;;  %v65_v36 = vunpack.c.l.bf16 %v1041_v6 }
 0x1aa   :  { %801 = vpow2.f32 %v262_v37 }
 0x1ab   :  { %803 = vpow2.f32 %v260_v38 }
 0x1ad   :  { %v255_v39 = vpop.xlane.xlu0 %254  ;;  %v252_v40 = vpop.xlane.xlu1 %251 }
 0x1ae   :  { %v259_v41 = vsub.f32 %v242_v24, %v255_v39  ;;  %v258_v42 = vsub.f32 %v241_v23, %v252_v40 }
 0x1b0   :  { %v266_v43 = vmul.f32 1.442695, %v259_v41  ;;  %v264_v44 = vmul.f32 1.442695, %v258_v42  ;;  %v64_v41 = vunpack.c.l.bf16 %v1039_v5 }
 0x1b2   :  { %805 = vpow2.f32 %v266_v43 }
 0x1b3   :  { %807 = vpow2.f32 %v264_v44 }
 0x1b4   :  { %v802_v45 = vpop.eup %801 }
 0x1b5   :  { %v271_v46 = vsel %vm243_vm2, %v802_v45, 0.0  ;;  %v804_v47 = vpop.eup %803 }
 0x1b6   :  { %272 = vadd.xlane.f32.xlu0 %v271_v46  ;;  %v268_v48 = vsel %vm243_vm2, %v804_v47, 0.0 }
 0x1ba   :  { %269 = vadd.xlane.f32.xlu0 %v268_v48 }
 0x1bc   :  { %v806_v49 = vpop.eup %805 }
 0x1bd   :  { %v277_v50 = vsel %vm243_vm2, %v806_v49, 0.0  ;;  %v808_v51 = vpop.eup %807 }
 0x1be   :  { %278 = vadd.xlane.f32.xlu1 %v277_v50  ;;  %v274_v52 = vsel %vm243_vm2, %v808_v51, 0.0 }
 0x1c2   :  { %275 = vadd.xlane.f32.xlu1 %v274_v52 }
 0x243   :  { %v273_v55 = vpop.xlane.xlu0 %272 }
 0x244   :  { %809 = vrcp.f32 %v273_v55 }
 0x247   :  { %v270_v56 = vpop.xlane.xlu0 %269 }
 0x248   :  { %811 = vrcp.f32 %v270_v56 }
 0x24b   :  { %v279_v57 = vpop.xlane.xlu1 %278 }
 0x24c   :  { %813 = vrcp.f32 %v279_v57 }
 0x24e   :  { %v810_v58 = vpop.eup %809 }
 0x24f   :  { %v285_v59 = vmul.f32 %v810_v58, %v273_v55  ;;  %v276_v60 = vpop.xlane.xlu1 %275 }
 0x250   :  { %815 = vrcp.f32 %v276_v60 }
 0x251   :  { %v289_v61 = vsub.f32 2.0, %v285_v59 }
 0x252   :  { %v812_v62 = vpop.eup %811 }
 0x253   :  { %v293_v63 = vmul.f32 %v810_v58, %v289_v61  ;;  %v284_v3 = vmul.f32 %v812_v62, %v270_v56 }
 0x255   :  { %v297_v4 = vmul.f32 %v802_v45, %v293_v63  ;;  %v288_v7 = vsub.f32 2.0, %v284_v3  ;;  %v800_v63 = vld [vmem:[#allocation5 + $0x8] sm:$0xff]  }
 0x256   :  { %v814_v8 = vpop.eup %813 }
 0x257   :  { %301 = vst.msk [vmem:[#allocation9 + $0x8] sm:$0xff] %vm243_vm2, %v297_v4  ;;  %v305_v9 = vpack.c.bf16 %v297_v4, %v297_v4  ;;  %v292_v10 = vmul.f32 %v812_v62, %v288_v7  ;;  %v287_v11 = vmul.f32 %v814_v8, %v279_v57  ;;  %v799_v62 = vld [vmem:[#allocation5] sm:$0xff]  }
 0x259   :  { %v296_v13 = vmul.f32 %v804_v47, %v292_v10  ;;  %v291_v14 = vsub.f32 2.0, %v287_v11  ;;  %764 = vmatmul.mubr.msk.bf16.vlgmr.msra.gmra.mrb[8].mxu1 %vm243_vm2, %v305_v9 }
 0x25a   :  { %v816_v15 = vpop.eup %815  ;;  %774 = vmatpush3.bf16.msra.mxu1 %v447_v12  ;;  %775 = vmatprep.mubr.msk.bf16.mxu1 %vm949_vm0, %v948_v0 }
 0x25b   :  { %300 = vst.msk [vmem:[#allocation9] sm:$0xff] %vm243_vm2, %v296_v13  ;;  %v304_v16 = vpack.c.bf16 %v296_v13, %v296_v13  ;;  %v295_v17 = vmul.f32 %v814_v8, %v291_v14  ;;  %v286_v18 = vmul.f32 %v816_v15, %v276_v60  ;;  %v704_v13 = vld [vmem:[#allocation7 + $0x1] ss:$0 sm:$0xff] }
 0x25d   :  { %v299_v20 = vmul.f32 %v806_v49, %v295_v17  ;;  %v290_v21 = vsub.f32 2.0, %v286_v18  ;;  %758 = vmatmul.mubr.msk.bf16.vlgmr.msra.gmra.mrb[8].mxu0 %vm243_vm2, %v304_v16  ;;  %v705_v17 = vld [vmem:[#allocation7 + $0x2] ss:$0 sm:$0xff] }
 0x25e   :  { %768 = vmatpush3.bf16.msra.mxu0 %v402_v19  ;;  %769 = vmatprep.mubr.msk.bf16.mxu0 %vm949_vm0, %v948_v0 }
 0x25f   :  { %303 = vst.msk [vmem:[#allocation9 + $0x18] sm:$0xff] %vm243_vm2, %v299_v20  ;;  %v307_v22 = vpack.c.bf16 %v299_v20, %v299_v20  ;;  %v294_v23 = vmul.f32 %v816_v15, %v290_v21  ;;  %779 = vmatprep.subr.bf16.mxu0 %v948_v0  ;;  %v706_v21 = vld [vmem:[#allocation7] ss:$0 sm:$0xff] }
 0x261   :  { %v298_v24 = vmul.f32 %v808_v51, %v294_v23  ;;  %776 = vmatmul.mubr.msk.bf16.vlgmr.msra.gmra.mrb[12].mxu1 %vm243_vm2, %v307_v22 }
 0x263   :  { %302 = vst.msk [vmem:[#allocation9 + $0x10] sm:$0xff] %vm243_vm2, %v298_v24  ;;  %v306_v25 = vpack.c.bf16 %v298_v24, %v298_v24 }
 0x265   :  { %770 = vmatmul.mubr.msk.bf16.vlgmr.msra.gmra.mrb[12].mxu0 %vm243_vm2, %v306_v25 }
 0x266   :  { %783 = vmatprep.mubr.msk.bf16.mxu0 %vm949_vm0, %v948_v0  ;;  %780 = vmatpush3.bf16.msra.mxu0 %v799_v62 }
 0x267   :  { %781 = vmatprep.subr.bf16.mxu0 %v948_v0 }
 0x26a   :  { %782 = vmatpush3.bf16.msra.mxu0 %v800_v63 }
 0x32c   :  { %v393_v27 = vpop.f32.mrb[8].mxu1 }
 0x32d   :  { %v490_v28 = vadd.f32 %v393_v27, %v63_v26  ;;  %v765_v29 = vpop.f32.mrb[9].mxu1 }
 0x32e   :  { %v396_v31 = vpop.f32.mrb[10].mxu1 }
 0x32f   :  { %v766_v32 = vpop.f32.mrb[11].mxu1  ;;  %495 = vrot.lane.b32.xlu0 %v490_v28, %s950_s2 }
 0x330   :  { %v348_v33 = vpop.f32.mrb[8].mxu0 }
 0x331   :  { %v489_v34 = vadd.f32 %v348_v33, %v62_v30  ;;  %v759_v35 = vpop.f32.mrb[9].mxu0 }
 0x332   :  { %v351_v37 = vpop.f32.mrb[10].mxu0 }
 0x333   :  { %493 = vst.msk [vmem:[#allocation8] sm:$0xff] %vm66_vm1, %v489_v34  ;;  %v760_v38 = vpop.f32.mrb[11].mxu0 }
 0x334   :  { %v483_v39 = vpop.f32.mrb[12].mxu1 }
 0x335   :  { %v492_v2 = vadd.f32 %v483_v39, %v65_v36  ;;  %v777_v40 = vpop.f32.mrb[13].mxu1 }
 0x336   :  { %v486_v42 = vpop.f32.mrb[14].mxu1 }
 0x337   :  { %502 = vrot.lane.b32.xlu1 %v492_v2, %s950_s2  ;;  %v778_v1 = vpop.f32.mrb[15].mxu1 }
 0x338   :  { %v438_v43 = vpop.f32.mrb[12].mxu0 }
 0x339   :  { %v491_v44 = vadd.f32 %v438_v43, %v64_v41  ;;  %v771_v45 = vpop.f32.mrb[13].mxu0 }
 0x33a   :  { %v441_v46 = vpop.f32.mrb[14].mxu0 }
 0x33b   :  { %500 = vst.msk [vmem:[#allocation8 + $0x8] sm:$0xff] %vm66_vm1, %v491_v44  ;;  %v772_v47 = vpop.f32.mrb[15].mxu0 }
 0x3a1   :  { %v496_v6 = vpop.permute.xlu0 %495 }
 0x3a2   :  { %499 = vst.msk [vmem:[#allocation8] sm:$0xff] %vm498_vm4, %v496_v6 }
 0x3a9   :  { %v503_v48 = vpop.permute.xlu1 %502  ;;  %v506_v49 = vld [vmem:[#allocation8] sm:$0xff] }
 0x3aa   :  { %505 = vst.msk [vmem:[#allocation8 + $0x8] sm:$0xff] %vm498_vm4, %v503_v48  ;;  %v514_v50 = vsel %vm513_vm5, %v506_v49, 0.0 }
 0x3ab   :  { %515 = vadd.xlane.f32.xlu1 %v514_v50 }
 0x3b1   :  { %v507_v5 = vld [vmem:[#allocation8 + $0x8] sm:$0xff] }
 0x3b2   :  { %v517_v51 = vsel %vm513_vm5, %v507_v5, 0.0 }
 0x3b3   :  { %518 = vadd.xlane.f32.xlu0 %v517_v51 }
 0x438   :  { %v516_v52 = vpop.xlane.xlu1 %515 }
 0x439   :  { %v521_v53 = vmul.f32 0.03125, %v516_v52 }
 0x43b   :  { %v523_v54 = vsub.f32 %v506_v49, %v521_v53 }
 0x43d   :  { %v525_v55 = vmul.f32 %v523_v54, %v523_v54 }
 0x43f   :  { %v527_v56 = vsel %vm513_vm5, %v525_v55, 0.0 }
 0x440   :  { %v519_v57 = vpop.xlane.xlu0 %518  ;;  %528 = vadd.xlane.f32.xlu0 %v527_v56 }
 0x441   :  { %v522_v58 = vmul.f32 0.03125, %v519_v57 }
 0x443   :  { %v524_v59 = vsub.f32 %v507_v5, %v522_v58 }
 0x445   :  { %v526_v60 = vmul.f32 %v524_v59, %v524_v59 }
 0x447   :  { %v530_v61 = vsel %vm513_vm5, %v526_v60, 0.0 }
 0x448   :  { %531 = vadd.xlane.f32.xlu1 %v530_v61 }
 0x4cd   :  { %v529_v3 = vpop.xlane.xlu0 %528 }
 0x4ce   :  { %v533_v4 = vmul.f32 0.03125, %v529_v3 }
 0x4d0   :  { %v535_v7 = vadd.f32 1e-05, %v533_v4 }
 0x4d2   :  { %817 = vrsqrt.f32 %v535_v7 }
 0x4d5   :  { %v532_v8 = vpop.xlane.xlu1 %531 }
 0x4d6   :  { %v534_v9 = vmul.f32 0.03125, %v532_v8 }
 0x4d8   :  { %v536_v10 = vadd.f32 1e-05, %v534_v9 }
 0x4da   :  { %819 = vrsqrt.f32 %v536_v10 }
 0x4dc   :  { %v818_v11 = vpop.eup %817 }
 0x4dd   :  { %v539_v12 = vmul.f32 %v818_v11, %v523_v54 }
 0x4df   :  { %v545_v15 = vmul.f32 %v704_v13, %v539_v12 }
 0x4e1   :  { %v551_v19 = vadd.f32 %v705_v17, %v545_v15 }
 0x4e4   :  { %v820_v14 = vpop.eup %819 }
 0x4e5   :  { %v540_v16 = vmul.f32 %v820_v14, %v524_v59 }
 0x4e7   :  { %v546_v18 = vmul.f32 %v704_v13, %v540_v16 }
 0x4e9   :  { %v552_v20 = vadd.f32 %v705_v17, %v546_v18 }
 0x4eb   :  { %v553_v0 = vpack.c.bf16 %v552_v20, %v551_v19 }
 0x4ed   :  { %784 = vmatmul.mubr.msk.bf16.vlgmr.msra.gmra.mrb[16].mxu0 %vm513_vm5, %v553_v0 }
 0x5c0   :  { %v611_v22 = vpop.f32.mrb[16].mxu0 }
 0x5c1   :  { %v612_v23 = vadd.f32 %v706_v21, %v611_v22  ;;  %v785_v24 = vpop.f32.mrb[17].mxu0 }
 0x5c2   :  { %v614_v25 = vpop.f32.mrb[18].mxu0 }
 0x5c3   :  { %v618_v26 = vmax.f32 %v612_v23, 0.0  ;;  %v615_v27 = vadd.f32 %v706_v21, %v614_v25  ;;  %v786_v28 = vpop.f32.mrb[19].mxu0 }
 0x5c5   :  { %v619_v29 = vmax.f32 %v615_v27, 0.0  ;;  %v620_v30 = vadd.f32 %v618_v26, %v551_v19 }
 0x5c7   :  { %v622_v31 = vsel %vm513_vm5, %v620_v30, 0.0  ;;  %v621_v32 = vadd.f32 %v619_v29, %v552_v20 }
 0x5c8   :  { %623 = vadd.xlane.f32.xlu0 %v622_v31 }
 0x5c9   :  { %v625_v33 = vsel %vm513_vm5, %v621_v32, 0.0 }
 0x5ca   :  { %626 = vadd.xlane.f32.xlu1 %v625_v33 }
 0x655   :  { %v624_v34 = vpop.xlane.xlu0 %623 }
 0x656   :  { %v628_v35 = vmul.f32 0.03125, %v624_v34 }
 0x657   :  { %v627_v36 = vpop.xlane.xlu1 %626 }
 0x658   :  { %v630_v37 = vsub.f32 %v620_v30, %v628_v35  ;;  %v629_v38 = vmul.f32 0.03125, %v627_v36 }
 0x65a   :  { %v631_v39 = vsub.f32 %v621_v32, %v629_v38  ;;  %v632_v2 = vmul.f32 %v630_v37, %v630_v37 }
 0x65c   :  { %v634_v40 = vsel %vm513_vm5, %v632_v2, 0.0  ;;  %v633_v41 = vmul.f32 %v631_v39, %v631_v39 }
 0x65d   :  { %635 = vadd.xlane.f32.xlu0 %v634_v40 }
 0x65e   :  { %v637_v42 = vsel %vm513_vm5, %v633_v41, 0.0 }
 0x65f   :  { %638 = vadd.xlane.f32.xlu1 %v637_v42 }
 0x660   :  { %902 = shalt.err (!%p899_p0)
}
 0x661   :  { %s903_s30 = scalar_lea.hbm %s1150_s4, 512 }
 0x662   :  { %p904_p1 = scmp.ne.s32.totalorder %s1150_s4, %s903_s30  ;;  %p907_p2 = scmp.lt.u32.totalorder %s903_s30, %s1150_s4 }
 0x664   :  { %p909_p3 = pnand %p907_p2, %p904_p1 }
 0x666   :  { %912 = shalt.err (!%p909_p3)
}
 0x667   :  { %s952_s9 = smov 128   ;;  %s953_s10 = smov 8   ;;  %v710_v48 = vld [vmem:[#allocation7 + $0x3] ss:$0 sm:$0xff]  ;;  %v711_v5 = vld [vmem:[#allocation7 + $0x4] ss:$0 sm:$0xff] }
 0x668   :  { %685 = dma.vmem_to_hbm [thread:$0]  %s680_s26, 512, %s1150_s4, [#allocation10], %s952_s9, %s952_s9, %s953_s10  }
 0x669   :  { %s954_s1 = smov [#allocation8]  }
 0x66a   :  { %s667_s13 = sshll.u32 %s954_s1, 4  ;;  %s668_s13 = int_to_ptr.vmem [resolvable:$true] %s667_s13 }
 0x66b   :  { %s913_s4 = scalar_lea.vmem %s668_s13, 256  ;;  %p918_p5 = scmp.lt.s32.totalorder %s668_s13, %s668_s13 }
 0x66c   :  { %p914_p4 = scmp.ne.s32.totalorder %s668_s13, %s913_s4  ;;  %p919_p6 = scmp.lt.s32.totalorder %s913_s4, %s913_s4 }
 0x66e   :  { %p920_p7 = por %p919_p6, %p918_p5 }
 0x670   :  { %p921_p8 = pnand %p920_p7, %p914_p4 }
 0x6ea   :  { %v636_v1 = vpop.xlane.xlu0 %635 }
 0x6eb   :  { %v640_v43 = vmul.f32 0.03125, %v636_v1 }
 0x6ec   :  { %v639_v44 = vpop.xlane.xlu1 %638 }
 0x6ed   :  { %v642_v45 = vadd.f32 1e-05, %v640_v43  ;;  %v641_v46 = vmul.f32 0.03125, %v639_v44 }
 0x6ef   :  { %821 = vrsqrt.f32 %v642_v45  ;;  %v643_v47 = vadd.f32 1e-05, %v641_v46 }
 0x6f1   :  { %823 = vrsqrt.f32 %v643_v47 }
 0x6f9   :  { %v822_v6 = vpop.eup %821 }
 0x6fa   :  { %v646_v49 = vmul.f32 %v822_v6, %v630_v37 }
 0x6fb   :  { %v824_v50 = vpop.eup %823 }
 0x6fc   :  { %v652_v51 = vmul.f32 %v710_v48, %v646_v49  ;;  %v647_v52 = vmul.f32 %v824_v50, %v631_v39 }
 0x6fe   :  { %v658_v53 = vadd.f32 %v711_v5, %v652_v51  ;;  %v653_v54 = vmul.f32 %v710_v48, %v647_v52 }
 0x700   :  { %660 = vst.msk [vmem:[#allocation8] sm:$0xff] %vm513_vm5, %v658_v53  ;;  %v659_v55 = vadd.f32 %v711_v5, %v653_v54 }
 0x702   :  { %661 = vst.msk [vmem:[#allocation8 + $0x8] sm:$0xff] %vm513_vm5, %v659_v55 }
 0x703   :  { %924 = shalt.err (!%p921_p8)
}
 0x704   :  { %s925_s16 = scalar_lea.hbm %s1149_s3, 256 }
 0x705   :  { %p926_p9 = scmp.ne.s32.totalorder %s1149_s3, %s925_s16  ;;  %p929_p10 = scmp.lt.u32.totalorder %s925_s16, %s1149_s3 }
 0x707   :  { %p931_p11 = pnand %p929_p10, %p926_p9 }
 0x709   :  { %934 = shalt.err (!%p931_p11)
}
 0x70a   :  { %673 = dma.vmem_to_hbm [thread:$0]  %s668_s13, 256, %s1149_s3, [#allocation4], %s952_s9, %s952_s9, %s953_s10  }
 0x70b   :  { %939 = dma.done.wait [#allocation4], 256  }
 0x70c   :  { %940 = vsyncadd [#allocation4], 4294967040 }
 0x70d   :  { %941 = dma.done.wait [#allocation10], 512  }
 0x70e   :  { %942 = vsyncadd [#allocation10], 4294966784 }
 0x70f   :  { %692 = vsyncpa [#allocation3], 1 }
 0x710   :  { %693 = vsyncpa [#allocation6], 1 }
 0x711   :  { %694 = vsyncpa [#allocation4], 1 }
 0x712   :  { %695 = vsyncpa [#allocation10], 1 }

</bundles_post_ra>
